<compile_context>
chip_gen: v7x
topology: tpu7x:2x2x1
jax: 0.10.0
libtpu: 0.0.40
codegen_flags: <defaults>
</compile_context>

<pallas_src>
import jax
import jax.numpy as jnp
from jax.experimental import pallas as pl
from jax.experimental.pallas import tpu as pltpu


NEG_INF_MASK = 100000000.0
_VMEM_LIMIT_BYTES = 48 * 1024 * 1024  # safe on v5e/v6e (128 MiB) and v7x (64 MiB)


# --------------------------------------------------------------------------
# Fused all-rank scoring + train-pair masking
# --------------------------------------------------------------------------
def _masked_score_kernel(u_ref, it_ref, mask_ref, out_ref):
    """One item-tile of: full_preds = where(mask, -1e8, u @ item_T)."""
    u = u_ref[...]              # (B, D)        bf16, resident across grid
    it = it_ref[...]            # (D, tile)     bf16, lane-dense item tile
    mask = mask_ref[...]        # (B, tile)     int8
    scores = jnp.dot(u, it, preferred_element_type=jnp.float32)
    out_ref[...] = jnp.where(mask != 0, -NEG_INF_MASK, scores)


def full_predict(batch_user_embeds, item_embeds_t, train_mask_i8, *, tile_items=512):
    """Fused all-rank prediction + _mask_predict.

    batch_user_embeds : (B, D)  bf16/f32
    item_embeds_t     : (D, I)  bf16/f32  (pre-transposed item table)
    train_mask_i8     : (B, I)  int8 (0/1)
    returns           : (B, I)  float32
    """
    B, D = batch_user_embeds.shape
    _, I = item_embeds_t.shape

    # Pad items up to a tile multiple; padded columns are masked (score -1e8).
    n_tiles = pl.cdiv(I, tile_items)
    I_pad = n_tiles * tile_items
    if I_pad != I:
        item_embeds_t = jnp.pad(item_embeds_t, ((0, 0), (0, I_pad - I)))
        train_mask_i8 = jnp.pad(
            train_mask_i8, ((0, 0), (0, I_pad - I)), constant_values=1
        )

    out = pl.pallas_call(
        _masked_score_kernel,
        out_shape=jax.ShapeDtypeStruct((B, I_pad), jnp.float32),
        grid_spec=pltpu.PrefetchScalarGridSpec(
            num_scalar_prefetch=0,
            grid=(n_tiles,),
            in_specs=[
                pl.BlockSpec((B, D), lambda j: (0, 0)),            # users: resident
                pl.BlockSpec((D, tile_items), lambda j: (0, j)),   # item tile (lane-dense)
                pl.BlockSpec((B, tile_items), lambda j: (0, j)),   # int8 mask tile
            ],
            out_specs=pl.BlockSpec((B, tile_items), lambda j: (0, j)),
        ),
        compiler_params=pltpu.CompilerParams(
            dimension_semantics=("parallel",),
            vmem_limit_bytes=_VMEM_LIMIT_BYTES,
        ),
    )(batch_user_embeds, item_embeds_t, train_mask_i8)
    return out[:, :I]


# --------------------------------------------------------------------------
# Standalone _mask_predict (elementwise), tiled over items
# --------------------------------------------------------------------------
def _mask_predict_kernel(preds_ref, mask_ref, out_ref):
    out_ref[...] = jnp.where(mask_ref[...] != 0, -NEG_INF_MASK, preds_ref[...])


def mask_predict(full_preds, train_mask_i8, *, tile_items=512):
    B, I = full_preds.shape
    n_tiles = pl.cdiv(I, tile_items)
    I_pad = n_tiles * tile_items
    if I_pad != I:
        full_preds = jnp.pad(full_preds, ((0, 0), (0, I_pad - I)))
        train_mask_i8 = jnp.pad(
            train_mask_i8, ((0, 0), (0, I_pad - I)), constant_values=1
        )

    out = pl.pallas_call(
        _mask_predict_kernel,
        out_shape=jax.ShapeDtypeStruct((B, I_pad), jnp.float32),
        grid_spec=pltpu.PrefetchScalarGridSpec(
            num_scalar_prefetch=0,
            grid=(n_tiles,),
            in_specs=[
                pl.BlockSpec((B, tile_items), lambda j: (0, j)),
                pl.BlockSpec((B, tile_items), lambda j: (0, j)),
            ],
            out_specs=pl.BlockSpec((B, tile_items), lambda j: (0, j)),
        ),
        compiler_params=pltpu.CompilerParams(
            dimension_semantics=("parallel",),
            vmem_limit_bytes=_VMEM_LIMIT_BYTES,
        ),
    )(full_preds, train_mask_i8)
    return out[:, :I]


# --------------------------------------------------------------------------
# Model wrapper (forward / full_predict / _mask_predict semantics)
# --------------------------------------------------------------------------
class BaseModel:
    """JAX/Pallas port of cf_frame BaseModel with deterministic embeddings."""

    def __init__(self, user_num, item_num, embed_dim=32, seed=0):
        self.user_num = user_num
        self.item_num = item_num
        key = jax.random.PRNGKey(seed)
        ku, ki = jax.random.split(key)
        # bf16 embeddings: halves HBM traffic in the memory-bound hot path.
        self.user_embeds = (
            jax.random.normal(ku, (user_num, embed_dim), jnp.float32) * 0.1
        ).astype(jnp.bfloat16)
        self.item_embeds = (
            jax.random.normal(ki, (item_num, embed_dim), jnp.float32) * 0.1
        ).astype(jnp.bfloat16)
        # Pre-transposed (D, I) item table, computed once: lane-dense item tiles.
        self.item_embeds_t = jnp.asarray(self.item_embeds.T)

    def forward(self):
        # TODO(synk): abstract in the reference; return the embedding tables.
        return self.user_embeds, self.item_embeds

    def full_predict(self, batch_data):
        batch_users, train_mask = batch_data
        user_embeds, _ = self.forward()
        batch_u = user_embeds[batch_users]                      # (B, D) gather (glue)
        mask_i8 = (train_mask != 0).astype(jnp.int8)            # cheap int8 mask
        return full_predict(batch_u, self.item_embeds_t, mask_i8)

    def _mask_predict(self, full_preds, train_mask):
        mask_i8 = (train_mask != 0).astype(jnp.int8)
        return mask_predict(full_preds.astype(jnp.float32), mask_i8)


if __name__ == "__main__":
    USER_NUM, ITEM_NUM, DIM, BATCH = 16, 256, 32, 8

    model = BaseModel(USER_NUM, ITEM_NUM, embed_dim=DIM, seed=0)

    key = jax.random.PRNGKey(0)
    k_users, k_mask = jax.random.split(key)
    batch_users = jax.random.randint(k_users, (BATCH,), 0, USER_NUM)
    train_mask = jax.random.bernoulli(k_mask, 0.1, (BATCH, ITEM_NUM))

    # Fused matmul + mask kernel (exercises the item-padding path: 256 -> 512).
    preds = model.full_predict((batch_users, train_mask))
    preds = jax.block_until_ready(preds)

    # Standalone _mask_predict kernel (tiled elementwise path).
    u32 = model.user_embeds[batch_users].astype(jnp.float32)
    it32 = model.item_embeds.astype(jnp.float32)
    raw_scores = u32 @ it32.T
    masked = jax.block_until_ready(model._mask_predict(raw_scores, train_mask))

    # Reference check (same bf16 inputs, f32 accumulate).
    ref = jnp.where(train_mask, -NEG_INF_MASK, raw_scores)
    assert preds.shape == (BATCH, ITEM_NUM)
    assert masked.shape == (BATCH, ITEM_NUM)
    assert jnp.allclose(preds, ref, atol=1e-3, rtol=1e-3)
    assert jnp.allclose(masked, ref, atol=1e-4, rtol=1e-4)

    print("KERNEL_OK")
</pallas_src>

<mosaic_0001>
module attributes {stable_mosaic.version = 11 : i64} {
  func.func @_masked_score_kernel(%arg0: i32, %arg1: memref<8x32xbf16, #tpu.memory_space<vmem>>, %arg2: memref<32x512xbf16, #tpu.memory_space<vmem>>, %arg3: memref<8x512xi8, #tpu.memory_space<vmem>>, %arg4: memref<8x512xf32, #tpu.memory_space<vmem>>) attributes {dimension_semantics = [#tpu.dimension_semantics<parallel>], iteration_bounds = array<i64: 1>, scalar_prefetch = 0 : i64, scratch_operands = 0 : i64, tpu.core_type = #tpu.core_type<tc>, window_params = [{pipeline_mode = #tpu.pipeline_mode<synchronous>, transform_indices = @transform_0, window_bounds = array<i64: 8, 32>}, {transform_indices = @transform_1, window_bounds = array<i64: 32, 512>}, {transform_indices = @transform_2, window_bounds = array<i64: 8, 512>}, {transform_indices = @transform_3, window_bounds = array<i64: 8, 512>}]} {
    %c0 = arith.constant 0 : index
    %c0_0 = arith.constant 0 : index
    %0 = vector.load %arg1[%c0, %c0_0] : memref<8x32xbf16, #tpu.memory_space<vmem>>, vector<8x32xbf16>
    %c0_1 = arith.constant 0 : index
    %c0_2 = arith.constant 0 : index
    %1 = vector.load %arg2[%c0_1, %c0_2] : memref<32x512xbf16, #tpu.memory_space<vmem>>, vector<32x512xbf16>
    %c0_3 = arith.constant 0 : index
    %c0_4 = arith.constant 0 : index
    %2 = vector.load %arg3[%c0_3, %c0_4] : memref<8x512xi8, #tpu.memory_space<vmem>>, vector<8x512xi8>
    %cst = arith.constant dense<0.000000e+00> : vector<8x512xf32>
    %3 = tpu.matmul %0, %1, %cst {dimension_numbers = #tpu.dot_dimension_numbers<[1], [0], [0], [1], [0, 0, 1, 1], [], []>} : vector<8x32xbf16>, vector<32x512xbf16>, vector<8x512xf32> -> vector<8x512xf32>
    %c0_i8 = arith.constant 0 : i8
    %4 = vector.broadcast %c0_i8 : i8 to vector<8x512xi8>
    %5 = arith.cmpi ne, %2, %4 : vector<8x512xi8>
    %cst_5 = arith.constant -1.000000e+08 : f32
    %6 = vector.broadcast %cst_5 : f32 to vector<8x512xf32>
    %7 = arith.select %5, %6, %3 : vector<8x512xi1>, vector<8x512xf32>
    %c0_6 = arith.constant 0 : index
    %c0_7 = arith.constant 0 : index
    %8 = vector.load %arg4[%c0_6, %c0_7] : memref<8x512xf32, #tpu.memory_space<vmem>>, vector<8x512xf32>
    tpu.vector_store %arg4[%c0_6, %c0_7], %7 {strides = array<i32>} : memref<8x512xf32, #tpu.memory_space<vmem>>, vector<8x512xf32>,
    return
  }
  func.func @transform_0(%arg0: i32) -> (i32, i32) {
    %c0_i32 = arith.constant 0 : i32
    %c0_i32_0 = arith.constant 0 : i32
    %c0_i32_1 = arith.constant 0 : i32
    return %c0_i32, %c0_i32_0 : i32, i32
  }
  func.func @transform_1(%arg0: i32) -> (i32, i32) {
    %c0_i32 = arith.constant 0 : i32
    %c0_i32_0 = arith.constant 0 : i32
    return %c0_i32, %arg0 : i32, i32
  }
  func.func @transform_2(%arg0: i32) -> (i32, i32) {
    %c0_i32 = arith.constant 0 : i32
    %c0_i32_0 = arith.constant 0 : i32
    return %c0_i32, %arg0 : i32, i32
  }
  func.func @transform_3(%arg0: i32) -> (i32, i32) {
    %c0_i32 = arith.constant 0 : i32
    %c0_i32_0 = arith.constant 0 : i32
    return %c0_i32, %arg0 : i32, i32
  }
}

</mosaic_0001>

<bundles_post_ra>
// kernel: tpu_custom_call.1
= control target key start
LH: loop header
LB: loop body
LE: loop exit
PB: predicated region body
PF: predicated region fallthrough
CT: control target
= control target key end

     0   :  { %8 = vsyncpa [#allocation3], 0  ;;  %s423_s0 = inlined_call_operand.hbm [shape: bf16[8,32], index: 0, kind: input, shape index: {}]   ;;  %s424_s1 = inlined_call_operand.hbm [shape: bf16[32,512], index: 1, kind: input, shape index: {}]   ;;  %s425_s2 = inlined_call_operand.hbm [shape: s8[8,512], index: 2, kind: input, shape index: {}]   ;;  %s426_s3 = inlined_call_operand.hbm [shape: f32[8,512], index: 3, kind: output, shape index: {}]  }
   0x1   :  { %9 = vsyncpa [#allocation6], 0 }
   0x2   :  { %10 = vsyncpa [#allocation4], 0  ;;  %s348_s12 = smov [#allocation5]   ;;  %s254_s16 = scalar_lea.hbm %s424_s1, 1024 }
   0x3   :  { %s26_s13 = sshll.u32 %s348_s12, 4  ;;  %p255_p0 = scmp.ne.s32.totalorder %s424_s1, %s254_s16  ;;  %s27_s13 = int_to_ptr.vmem [resolvable:$true] %s26_s13 }
   0x4   :  { %p258_p1 = scmp.lt.u32.totalorder %s254_s16, %s424_s1 }
   0x6   :  { %p260_p2 = pnand %p258_p1, %p255_p0 }
   0x8   :  { %263 = shalt.err (!%p260_p2)
}
   0x9   :  { %s264_s21 = scalar_lea.vmem %s27_s13, 1024  ;;  %p269_p4 = scmp.lt.s32.totalorder %s27_s13, %s27_s13 }
   0xa   :  { %p265_p3 = scmp.ne.s32.totalorder %s27_s13, %s264_s21  ;;  %p270_p5 = scmp.lt.s32.totalorder %s264_s21, %s264_s21 }
   0xc   :  { %p271_p6 = por %p270_p5, %p269_p4 }
   0xe   :  { %p272_p7 = pnand %p271_p6, %p265_p3 }
  0x10   :  { %275 = shalt.err (!%p272_p7)
}
  0x11   :  { %s349_s22 = smov 256   ;;  %s350_s23 = smov 16  }
  0x12   :  { %32 = dma.hbm_to_vmem [thread:$0]  %s424_s1, 1024, %s27_s13, [#allocation6], %s349_s22, %s349_s22, %s350_s23  }
  0x13   :  { %s351_s26 = smov [#allocation2]   ;;  %s352_s28 = smov [#allocation7]  }
  0x14   :  { %s17_s27 = sshll.u32 %s351_s26, 4  ;;  %s39_s29 = sshll.u32 %s352_s28, 4  ;;  %s18_s27 = int_to_ptr.vmem [resolvable:$true] %s17_s27  ;;  %s40_s29 = int_to_ptr.vmem [resolvable:$true] %s39_s29 }
  0x15   :  { %s276_s5 = scalar_lea.hbm %s423_s0, 64 }
  0x16   :  { %p277_p8 = scmp.ne.s32.totalorder %s423_s0, %s276_s5  ;;  %p280_p9 = scmp.lt.u32.totalorder %s276_s5, %s423_s0 }
  0x18   :  { %p282_p10 = pnand %p280_p9, %p277_p8 }
  0x1a   :  { %285 = shalt.err (!%p282_p10)
}
  0x1b   :  { %s286_s1 = scalar_lea.vmem %s18_s27, 64  ;;  %p291_p12 = scmp.lt.s32.totalorder %s18_s27, %s18_s27 }
  0x1c   :  { %p287_p11 = scmp.ne.s32.totalorder %s18_s27, %s286_s1  ;;  %p292_p13 = scmp.lt.s32.totalorder %s286_s1, %s286_s1 }
  0x1e   :  { %p293_p0 = por %p292_p13, %p291_p12 }
  0x20   :  { %p294_p1 = pnand %p293_p0, %p287_p11 }
  0x22   :  { %297 = shalt.err (!%p294_p1)
}
  0x23   :  { %20 = dma.hbm_to_vmem [thread:$0]  %s423_s0, 64, %s18_s27, [#allocation3]  }
  0x24   :  { %s298_s14 = scalar_lea.hbm %s425_s2, 128 }
  0x25   :  { %p299_p2 = scmp.ne.s32.totalorder %s425_s2, %s298_s14  ;;  %p302_p3 = scmp.lt.u32.totalorder %s298_s14, %s425_s2 }
  0x27   :  { %p304_p4 = pnand %p302_p3, %p299_p2 }
  0x29   :  { %307 = shalt.err (!%p304_p4)
}
  0x2a   :  { %s308_s19 = scalar_lea.vmem %s40_s29, 128  ;;  %p313_p6 = scmp.lt.s32.totalorder %s40_s29, %s40_s29 }
  0x2b   :  { %p309_p5 = scmp.ne.s32.totalorder %s40_s29, %s308_s19  ;;  %p314_p7 = scmp.lt.s32.totalorder %s308_s19, %s308_s19 }
  0x2d   :  { %p315_p8 = por %p314_p7, %p313_p6 }
  0x2f   :  { %p316_p9 = pnand %p315_p8, %p309_p5 }
  0x31   :  { %319 = shalt.err (!%p316_p9)
}
  0x32   :  { %42 = dma.hbm_to_vmem [thread:$0]  %s425_s2, 128, %s40_s29, [#allocation6]  }
  0x33   :  { %342 = dma.done.wait [#allocation3], 64  }
  0x34   :  { %343 = vsyncadd [#allocation3], 4294967232 }
  0x35   :  { %344 = dma.done.wait [#allocation6], 1152  }
  0x36   :  { %345 = vsyncadd [#allocation6], 4294966144  ;;  %v353_v0 = vmov 0   ;;  %v242_v1 = vld [vmem:[#allocation5 + $0x4] ss:$16 sps:$4 sm:$0xff]   ;;  %vm105_vm0 = vcmask 261120  }
  0x37   :  { %141 = vmatprep.mubr.bf16.mxu0 %v353_v0  ;;  %182 = vmatprep.mubr.bf16.mxu1 %v353_v0  ;;  %v244_v2 = vld [vmem:[#allocation5 + $0xc] ss:$16 sps:$4 sm:$0xff]   ;;  %v246_v3 = vld [vmem:[#allocation5] ss:$16 sps:$4 sm:$0xff]   ;;  %v247_v4 = vld [vmem:[#allocation5 + $0x8] ss:$16 sps:$4 sm:$0xff]  }
  0x38   :  { %109 = vmatprep.subr.bf16.mxu0 %v242_v1  ;;  %150 = vmatprep.subr.bf16.mxu1 %v244_v2  ;;  %v248_v5 = vld [vmem:[#allocation5 + $0x24] ss:$16 sps:$4 sm:$0xff]   ;;  %v250_v6 = vld [vmem:[#allocation5 + $0x2c] ss:$16 sps:$4 sm:$0xff]   ;;  %v252_v7 = vld [vmem:[#allocation5 + $0x20] ss:$16 sps:$4 sm:$0xff]  }
  0x39   :  { %110 = vmatpush1.bf16.msra.mxu0 %v246_v3  ;;  %151 = vmatpush1.bf16.msra.mxu1 %v247_v4  ;;  %v253_v8 = vld [vmem:[#allocation5 + $0x28] ss:$16 sps:$4 sm:$0xff]   ;;  %v55_v9 = vld [vmem:[#allocation2] sm:$0xf]  ;;  %v64_v10 = vld [vmem:[#allocation7] sm:$0xff]  ;;  %s354_s2 = smov [#allocation8]  }
  0x3a   :  { %111 = vmatprep.subr.bf16.mxu0 %v248_v5  ;;  %152 = vmatprep.subr.bf16.mxu1 %v250_v6  ;;  %vm191_vm1 = vnez %v64_v10  ;;  %s215_s21 = sshll.u32 %s354_s2, 4  ;;  %s216_s21 = int_to_ptr.vmem [resolvable:$true] %s215_s21 }
  0x3b   :  { %v192_v11 = vsel %vm191_vm1, 16843009, %v353_v0  ;;  %s320_s22 = scalar_lea.vmem %s216_s21, 512  ;;  %p325_p11 = scmp.lt.s32.totalorder %s216_s21, %s216_s21 }
  0x3c   :  { %v193_v12 = vunpack.c.0.s8 %v192_v11  ;;  %v195_v13 = vunpack.c.2.s8 %v192_v11  ;;  %v194_v14 = vunpack.c.1.s8 %v192_v11  ;;  %v196_v15 = vunpack.c.3.s8 %v192_v11  ;;  %p321_p10 = scmp.ne.s32.totalorder %s216_s21, %s320_s22  ;;  %p326_p12 = scmp.lt.s32.totalorder %s320_s22, %s320_s22 }
  0x3d   :  { %112 = vmatpush1.bf16.msra.mxu0 %v252_v7  ;;  %153 = vmatpush1.bf16.msra.mxu1 %v253_v8 }
  0x3e   :  { %vm197_vm2 = vcmp.ne.s32.totalorder %v193_v12, 0  ;;  %vm199_vm3 = vcmp.ne.s32.totalorder %v195_v13, 0  ;;  %vm198_vm4 = vcmp.ne.s32.totalorder %v194_v14, 0  ;;  %vm200_vm5 = vcmp.ne.s32.totalorder %v196_v15, 0  ;;  %p327_p13 = por %p326_p12, %p325_p11 }
  0x40   :  { %233 = vmatmul.mubr.msk.bf16.vlgmr.msra.gmra.mrb[0].mxu0 %vm105_vm0, %v55_v9  ;;  %234 = vmatmul.mubr.msk.bf16.vlgmr.msra.gmra.mrb[0].mxu1 %vm105_vm0, %v55_v9  ;;  %p328_p0 = pnand %p327_p13, %p321_p10 }
 0x113   :  { %v143_v16 = vpop.f32.mrb[0].mxu0  ;;  %v184_v17 = vpop.f32.mrb[0].mxu1 }
 0x114   :  { %v201_v18 = vsel %vm197_vm2, -1e+08, %v143_v16  ;;  %v203_v19 = vsel %vm199_vm3, -1e+08, %v184_v17  ;;  %v145_v20 = vpop.f32.mrb[1].mxu0  ;;  %v186_v21 = vpop.f32.mrb[1].mxu1 }
 0x115   :  { %205 = vst [vmem:[#allocation8] sm:$0xff] %v201_v18  ;;  %207 = vst [vmem:[#allocation8 + $0x10] sm:$0xff] %v203_v19  ;;  %v202_v22 = vsel %vm198_vm4, -1e+08, %v145_v20  ;;  %v204_v23 = vsel %vm200_vm5, -1e+08, %v186_v21 }
 0x116   :  { %v147_v24 = vpop.f32.mrb[2].mxu0  ;;  %v188_v25 = vpop.f32.mrb[2].mxu1  ;;  %206 = vst [vmem:[#allocation8 + $0x8] sm:$0xff] %v202_v22  ;;  %208 = vst [vmem:[#allocation8 + $0x18] sm:$0xff] %v204_v23 }
 0x117   :  { %v148_v26 = vpop.f32.mrb[3].mxu0  ;;  %v189_v27 = vpop.f32.mrb[3].mxu1 }
 0x118   :  { %331 = shalt.err (!%p328_p0)
}
 0x119   :  { %s332_s25 = scalar_lea.hbm %s426_s3, 512 }
 0x11a   :  { %p333_p1 = scmp.ne.s32.totalorder %s426_s3, %s332_s25  ;;  %p336_p2 = scmp.lt.u32.totalorder %s332_s25, %s426_s3 }
 0x11c   :  { %p338_p3 = pnand %p336_p2, %p333_p1 }
 0x11e   :  { %341 = shalt.err (!%p338_p3)
}
 0x11f   :  { %218 = dma.vmem_to_hbm [thread:$0]  %s216_s21, 512, %s426_s3, [#allocation4]  }
 0x120   :  { %346 = dma.done.wait [#allocation4], 512  }
 0x121   :  { %347 = vsyncadd [#allocation4], 4294966784 }
 0x122   :  { %222 = vsyncpa [#allocation3], 1 }
 0x123   :  { %223 = vsyncpa [#allocation6], 1 }
 0x124   :  { %224 = vsyncpa [#allocation4], 1 }

</bundles_post_ra>
